<compile_context>
chip_gen: v6e
topology: v6e:2x2x1
jax: 0.10.0
libtpu: 0.0.40
codegen_flags: <defaults>
</compile_context>

<pallas_src>
import functools

import jax
import jax.numpy as jnp
from jax import lax
from jax.experimental import pallas as pl
from jax.experimental.pallas import tpu as pltpu


def _lstm_fc_kernel(gx_ref, whh_ref, wfc_ref, bfc_ref, out_ref):
    # gx_ref : (S, B, 4H)  per-token gate pre-activations (x@W_ih^T + b), time-major,
    #                      gate order repacked to [i, f, o, g]
    # whh_ref: (H, 4H)     hidden->gates weights (repacked, already transposed)
    # wfc_ref: (H, O)      final linear weight (already transposed)
    # bfc_ref: (1, O)
    # out_ref: (B, O)
    S, B, H4 = gx_ref.shape
    H = H4 // 4

    whh = whh_ref[...]  # hoisted weight load (reused every step)

    h0 = jnp.zeros((B, H), jnp.float32)
    c0 = jnp.zeros((B, H), jnp.float32)

    def step(t, carry):
        h, c = carry
        # Single matmul per step on the serial critical path.
        gates = jnp.dot(h, whh, preferred_element_type=jnp.float32) + gx_ref[t]
        # One sigmoid over [i|f|o], one tanh over [g].
        sig = jax.nn.sigmoid(gates[:, :3 * H])
        g_g = jnp.tanh(gates[:, 3 * H:])
        i_g = sig[:, 0:H]
        f_g = sig[:, H:2 * H]
        o_g = sig[:, 2 * H:3 * H]
        c_new = f_g * c + i_g * g_g
        h_new = o_g * jnp.tanh(c_new)
        return h_new, c_new

    # S is static -> fully unroll so the scheduler sees the whole recurrence.
    h_final, _ = lax.fori_loop(0, S, step, (h0, c0), unroll=True)

    # Final FC on the last hidden state.  O=8 (<128 lanes) => masked store;
    # negligible at this size.  Pad O to 128 in glue if output_dim ever grows.
    out_ref[...] = (jnp.dot(h_final, wfc_ref[...],
                            preferred_element_type=jnp.float32)
                    + bfc_ref[...])


@jax.jit
def wine_embedding_forward(tokens, emb_table, w_ih, w_hh, b_ih, b_hh, w_fc, b_fc):
    """tokens: (B, S) int32.  Returns (B, output_dim) float32.

    Matches PyTorch:
        embedded = Embedding(tokens); _, (h, _) = LSTM(embedded); fc(h.squeeze(0))
    """
    B, S = tokens.shape
    H = emb_table.shape[1]
    O = w_fc.shape[0]

    # --- glue: gate repack [i,f,g,o] -> [i,f,o,g] --------------------------
    perm = jnp.concatenate([
        jnp.arange(0, H),            # i
        jnp.arange(H, 2 * H),        # f
        jnp.arange(3 * H, 4 * H),    # o
        jnp.arange(2 * H, 3 * H),    # g
    ])
    w_ih_r = w_ih[perm]                       # (4H, H)
    w_hh_r = w_hh[perm]                       # (4H, H)
    bias_r = (b_ih + b_hh)[perm]              # (4H,)

    # --- glue: precompute per-token gate pre-activations -------------------
    # (vocab, H) @ (H, 4H) + bias  ->  (vocab, 4H); tiny (e.g. 50x128 = 25 KB).
    gate_table = emb_table @ w_ih_r.T + bias_r[None, :]
    # Time-major gather directly: tokens.T is (S, B) -> gx is (S, B, 4H).
    gx = jnp.take(gate_table, tokens.T, axis=0).astype(jnp.float32)

    whh_t = w_hh_r.T                          # (H, 4H)
    wfc_t = w_fc.T                            # (H, O)
    bfc = b_fc[None, :]                       # (1, O)

    # Everything fits trivially in VMEM at these sizes (gx = S*B*4H*4 bytes),
    # so a single no-grid invocation is the right shape of launch.
    # TODO(synk): if S*B*H scales toward tens of MiB (v7x has 64 MiB VMEM),
    # switch to a gridded BlockSpec streaming S-chunks with h/c in VMEM scratch.
    vmem = pl.BlockSpec(memory_space=pltpu.MemorySpace.VMEM)
    out = pl.pallas_call(
        _lstm_fc_kernel,
        out_shape=jax.ShapeDtypeStruct((B, O), jnp.float32),
        in_specs=[vmem] * 4,
        out_specs=vmem,
    )(gx, whh_t, wfc_t, bfc)
    return out


def _reference_forward(tokens, emb_table, w_ih, w_hh, b_ih, b_hh, w_fc, b_fc):
    """Pure-JAX reference matching PyTorch nn.LSTM semantics (gate order [i,f,g,o])."""
    embedded = jnp.take(emb_table, tokens, axis=0)  # (B, S, H)
    B, S, H = embedded.shape
    h = jnp.zeros((B, H), jnp.float32)
    c = jnp.zeros((B, H), jnp.float32)
    for t in range(S):
        x_t = embedded[:, t, :]
        gates = x_t @ w_ih.T + b_ih + h @ w_hh.T + b_hh
        i_g = jax.nn.sigmoid(gates[:, 0 * H:1 * H])
        f_g = jax.nn.sigmoid(gates[:, 1 * H:2 * H])
        g_g = jnp.tanh(gates[:, 2 * H:3 * H])
        o_g = jax.nn.sigmoid(gates[:, 3 * H:4 * H])
        c = f_g * c + i_g * g_g
        h = o_g * jnp.tanh(c)
    return h @ w_fc.T + b_fc


if __name__ == "__main__":
    # Small shapes consistent with the module.
    input_dim = 50     # vocab size
    hidden_dim = 32
    output_dim = 8
    batch = 2
    seq = 8

    key = jax.random.PRNGKey(0)
    k_tok, k_emb, k_wih, k_whh, k_bih, k_bhh, k_wfc, k_bfc = jax.random.split(key, 8)

    tokens = jax.random.randint(k_tok, (batch, seq), 0, input_dim, dtype=jnp.int32)

    # Deterministic parameter init (PyTorch-like scales).
    emb_table = jax.random.normal(k_emb, (input_dim, hidden_dim), jnp.float32)
    bound = 1.0 / jnp.sqrt(hidden_dim)
    w_ih = jax.random.uniform(k_wih, (4 * hidden_dim, hidden_dim), jnp.float32, -bound, bound)
    w_hh = jax.random.uniform(k_whh, (4 * hidden_dim, hidden_dim), jnp.float32, -bound, bound)
    b_ih = jax.random.uniform(k_bih, (4 * hidden_dim,), jnp.float32, -bound, bound)
    b_hh = jax.random.uniform(k_bhh, (4 * hidden_dim,), jnp.float32, -bound, bound)
    w_fc = jax.random.uniform(k_wfc, (output_dim, hidden_dim), jnp.float32, -bound, bound)
    b_fc = jax.random.uniform(k_bfc, (output_dim,), jnp.float32, -bound, bound)

    out = wine_embedding_forward(tokens, emb_table, w_ih, w_hh, b_ih, b_hh, w_fc, b_fc)
    out = jax.block_until_ready(out)

    ref = _reference_forward(tokens, emb_table, w_ih, w_hh, b_ih, b_hh, w_fc, b_fc)
    assert out.shape == (batch, output_dim)
    assert jnp.allclose(out, ref, atol=1e-4, rtol=1e-4), "mismatch vs reference"

    print("KERNEL_OK")
</pallas_src>

<mosaic_0001>
module attributes {stable_mosaic.version = 11 : i64} {
  func.func @_lstm_fc_kernel(%arg0: memref<8x2x128xf32, #tpu.memory_space<vmem>>, %arg1: memref<32x128xf32, #tpu.memory_space<vmem>>, %arg2: memref<32x8xf32, #tpu.memory_space<vmem>>, %arg3: memref<1x8xf32, #tpu.memory_space<vmem>>, %arg4: memref<2x8xf32, #tpu.memory_space<vmem>>) attributes {dimension_semantics = [], scalar_prefetch = 0 : i64, scratch_operands = 0 : i64, tpu.core_type = #tpu.core_type<tc>} {
    %c0 = arith.constant 0 : index
    %c0_0 = arith.constant 0 : index
    %0 = vector.load %arg1[%c0, %c0_0] : memref<32x128xf32, #tpu.memory_space<vmem>>, vector<32x128xf32>
    %cst = arith.constant 0.000000e+00 : f32
    %1 = vector.broadcast %cst : f32 to vector<2x32xf32>
    %cst_1 = arith.constant 0.000000e+00 : f32
    %2 = vector.broadcast %cst_1 : f32 to vector<2x32xf32>
    %c0_i32 = arith.constant 0 : i32
    %cst_2 = arith.constant dense<0.000000e+00> : vector<2x128xf32>
    %3 = tpu.matmul %1, %0, %cst_2 {dimension_numbers = #tpu.dot_dimension_numbers<[1], [0], [0], [1], [0, 0, 1, 1], [], []>} : vector<2x32xf32>, vector<32x128xf32>, vector<2x128xf32> -> vector<2x128xf32>
    %4 = arith.index_cast %c0_i32 : i32 to index
    %c0_3 = arith.constant 0 : index
    %c0_4 = arith.constant 0 : index
    %5 = vector.load %arg0[%4, %c0_3, %c0_4] : memref<8x2x128xf32, #tpu.memory_space<vmem>>, vector<1x2x128xf32>
    %6 = vector.shape_cast %5 : vector<1x2x128xf32> to vector<2x128xf32>
    %7 = arith.addf %3, %6 : vector<2x128xf32>
    %8 = vector.extract_strided_slice %7 {offsets = [0, 0], sizes = [2, 96], strides = [1, 1]} : vector<2x128xf32> to vector<2x96xf32>
    %9 = arith.negf %8 : vector<2x96xf32>
    %10 = math.exp %9 : vector<2x96xf32>
    %cst_5 = arith.constant 1.000000e+00 : f32
    %11 = vector.broadcast %cst_5 : f32 to vector<2x96xf32>
    %12 = arith.addf %11, %10 : vector<2x96xf32>
    %13 = arith.divf %11, %12 : vector<2x96xf32>
    %14 = vector.extract_strided_slice %7 {offsets = [0, 96], sizes = [2, 32], strides = [1, 1]} : vector<2x128xf32> to vector<2x32xf32>
    %15 = math.tanh %14 : vector<2x32xf32>
    %16 = vector.extract_strided_slice %13 {offsets = [0, 0], sizes = [2, 32], strides = [1, 1]} : vector<2x96xf32> to vector<2x32xf32>
    %17 = vector.extract_strided_slice %13 {offsets = [0, 32], sizes = [2, 32], strides = [1, 1]} : vector<2x96xf32> to vector<2x32xf32>
    %18 = vector.extract_strided_slice %13 {offsets = [0, 64], sizes = [2, 32], strides = [1, 1]} : vector<2x96xf32> to vector<2x32xf32>
    %19 = arith.mulf %17, %2 : vector<2x32xf32>
    %20 = arith.mulf %16, %15 : vector<2x32xf32>
    %21 = arith.addf %19, %20 : vector<2x32xf32>
    %22 = math.tanh %21 : vector<2x32xf32>
    %23 = arith.mulf %18, %22 : vector<2x32xf32>
    %c1_i32 = arith.constant 1 : i32
    %cst_6 = arith.constant dense<0.000000e+00> : vector<2x128xf32>
    %24 = tpu.matmul %23, %0, %cst_6 {dimension_numbers = #tpu.dot_dimension_numbers<[1], [0], [0], [1], [0, 0, 1, 1], [], []>} : vector<2x32xf32>, vector<32x128xf32>, vector<2x128xf32> -> vector<2x128xf32>
    %25 = arith.index_cast %c1_i32 : i32 to index
    %c0_7 = arith.constant 0 : index
    %c0_8 = arith.constant 0 : index
    %26 = vector.load %arg0[%25, %c0_7, %c0_8] : memref<8x2x128xf32, #tpu.memory_space<vmem>>, vector<1x2x128xf32>
    %27 = vector.shape_cast %26 : vector<1x2x128xf32> to vector<2x128xf32>
    %28 = arith.addf %24, %27 : vector<2x128xf32>
    %29 = vector.extract_strided_slice %28 {offsets = [0, 0], sizes = [2, 96], strides = [1, 1]} : vector<2x128xf32> to vector<2x96xf32>
    %30 = arith.negf %29 : vector<2x96xf32>
    %31 = math.exp %30 : vector<2x96xf32>
    %cst_9 = arith.constant 1.000000e+00 : f32
    %32 = vector.broadcast %cst_9 : f32 to vector<2x96xf32>
    %33 = arith.addf %32, %31 : vector<2x96xf32>
    %34 = arith.divf %32, %33 : vector<2x96xf32>
    %35 = vector.extract_strided_slice %28 {offsets = [0, 96], sizes = [2, 32], strides = [1, 1]} : vector<2x128xf32> to vector<2x32xf32>
    %36 = math.tanh %35 : vector<2x32xf32>
    %37 = vector.extract_strided_slice %34 {offsets = [0, 0], sizes = [2, 32], strides = [1, 1]} : vector<2x96xf32> to vector<2x32xf32>
    %38 = vector.extract_strided_slice %34 {offsets = [0, 32], sizes = [2, 32], strides = [1, 1]} : vector<2x96xf32> to vector<2x32xf32>
    %39 = vector.extract_strided_slice %34 {offsets = [0, 64], sizes = [2, 32], strides = [1, 1]} : vector<2x96xf32> to vector<2x32xf32>
    %40 = arith.mulf %38, %21 : vector<2x32xf32>
    %41 = arith.mulf %37, %36 : vector<2x32xf32>
    %42 = arith.addf %40, %41 : vector<2x32xf32>
    %43 = math.tanh %42 : vector<2x32xf32>
    %44 = arith.mulf %39, %43 : vector<2x32xf32>
    %c2_i32 = arith.constant 2 : i32
    %cst_10 = arith.constant dense<0.000000e+00> : vector<2x128xf32>
    %45 = tpu.matmul %44, %0, %cst_10 {dimension_numbers = #tpu.dot_dimension_numbers<[1], [0], [0], [1], [0, 0, 1, 1], [], []>} : vector<2x32xf32>, vector<32x128xf32>, vector<2x128xf32> -> vector<2x128xf32>
    %46 = arith.index_cast %c2_i32 : i32 to index
    %c0_11 = arith.constant 0 : index
    %c0_12 = arith.constant 0 : index
    %47 = vector.load %arg0[%46, %c0_11, %c0_12] : memref<8x2x128xf32, #tpu.memory_space<vmem>>, vector<1x2x128xf32>
    %48 = vector.shape_cast %47 : vector<1x2x128xf32> to vector<2x128xf32>
    %49 = arith.addf %45, %48 : vector<2x128xf32>
    %50 = vector.extract_strided_slice %49 {offsets = [0, 0], sizes = [2, 96], strides = [1, 1]} : vector<2x128xf32> to vector<2x96xf32>
    %51 = arith.negf %50 : vector<2x96xf32>
    %52 = math.exp %51 : vector<2x96xf32>
    %cst_13 = arith.constant 1.000000e+00 : f32
    %53 = vector.broadcast %cst_13 : f32 to vector<2x96xf32>
    %54 = arith.addf %53, %52 : vector<2x96xf32>
    %55 = arith.divf %53, %54 : vector<2x96xf32>
    %56 = vector.extract_strided_slice %49 {offsets = [0, 96], sizes = [2, 32], strides = [1, 1]} : vector<2x128xf32> to vector<2x32xf32>
    %57 = math.tanh %56 : vector<2x32xf32>
    %58 = vector.extract_strided_slice %55 {offsets = [0, 0], sizes = [2, 32], strides = [1, 1]} : vector<2x96xf32> to vector<2x32xf32>
    %59 = vector.extract_strided_slice %55 {offsets = [0, 32], sizes = [2, 32], strides = [1, 1]} : vector<2x96xf32> to vector<2x32xf32>
    %60 = vector.extract_strided_slice %55 {offsets = [0, 64], sizes = [2, 32], strides = [1, 1]} : vector<2x96xf32> to vector<2x32xf32>
    %61 = arith.mulf %59, %42 : vector<2x32xf32>
    %62 = arith.mulf %58, %57 : vector<2x32xf32>
    %63 = arith.addf %61, %62 : vector<2x32xf32>
    %64 = math.tanh %63 : vector<2x32xf32>
    %65 = arith.mulf %60, %64 : vector<2x32xf32>
    %c3_i32 = arith.constant 3 : i32
    %cst_14 = arith.constant dense<0.000000e+00> : vector<2x128xf32>
    %66 = tpu.matmul %65, %0, %cst_14 {dimension_numbers = #tpu.dot_dimension_numbers<[1], [0], [0], [1], [0, 0, 1, 1], [], []>} : vector<2x32xf32>, vector<32x128xf32>, vector<2x128xf32> -> vector<2x128xf32>
    %67 = arith.index_cast %c3_i32 : i32 to index
    %c0_15 = arith.constant 0 : index
    %c0_16 = arith.constant 0 : index
    %68 = vector.load %arg0[%67, %c0_15, %c0_16] : memref<8x2x128xf32, #tpu.memory_space<vmem>>, vector<1x2x128xf32>
    %69 = vector.shape_cast %68 : vector<1x2x128xf32> to vector<2x128xf32>
    %70 = arith.addf %66, %69 : vector<2x128xf32>
    %71 = vector.extract_strided_slice %70 {offsets = [0, 0], sizes = [2, 96], strides = [1, 1]} : vector<2x128xf32> to vector<2x96xf32>
    %72 = arith.negf %71 : vector<2x96xf32>
    %73 = math.exp %72 : vector<2x96xf32>
    %cst_17 = arith.constant 1.000000e+00 : f32
    %74 = vector.broadcast %cst_17 : f32 to vector<2x96xf32>
    %75 = arith.addf %74, %73 : vector<2x96xf32>
    %76 = arith.divf %74, %75 : vector<2x96xf32>
    %77 = vector.extract_strided_slice %70 {offsets = [0, 96], sizes = [2, 32], strides = [1, 1]} : vector<2x128xf32> to vector<2x32xf32>
    %78 = math.tanh %77 : vector<2x32xf32>
    %79 = vector.extract_strided_slice %76 {offsets = [0, 0], sizes = [2, 32], strides = [1, 1]} : vector<2x96xf32> to vector<2x32xf32>
    %80 = vector.extract_strided_slice %76 {offsets = [0, 32], sizes = [2, 32], strides = [1, 1]} : vector<2x96xf32> to vector<2x32xf32>
    %81 = vector.extract_strided_slice %76 {offsets = [0, 64], sizes = [2, 32], strides = [1, 1]} : vector<2x96xf32> to vector<2x32xf32>
    %82 = arith.mulf %80, %63 : vector<2x32xf32>
    %83 = arith.mulf %79, %78 : vector<2x32xf32>
    %84 = arith.addf %82, %83 : vector<2x32xf32>
    %85 = math.tanh %84 : vector<2x32xf32>
    %86 = arith.mulf %81, %85 : vector<2x32xf32>
    %c4_i32 = arith.constant 4 : i32
    %cst_18 = arith.constant dense<0.000000e+00> : vector<2x128xf32>
    %87 = tpu.matmul %86, %0, %cst_18 {dimension_numbers = #tpu.dot_dimension_numbers<[1], [0], [0], [1], [0, 0, 1, 1], [], []>} : vector<2x32xf32>, vector<32x128xf32>, vector<2x128xf32> -> vector<2x128xf32>
    %88 = arith.index_cast %c4_i32 : i32 to index
    %c0_19 = arith.constant 0 : index
    %c0_20 = arith.constant 0 : index
    %89 = vector.load %arg0[%88, %c0_19, %c0_20] : memref<8x2x128xf32, #tpu.memory_space<vmem>>, vector<1x2x128xf32>
    %90 = vector.shape_cast %89 : vector<1x2x128xf32> to vector<2x128xf32>
    %91 = arith.addf %87, %90 : vector<2x128xf32>
    %92 = vector.extract_strided_slice %91 {offsets = [0, 0], sizes = [2, 96], strides = [1, 1]} : vector<2x128xf32> to vector<2x96xf32>
    %93 = arith.negf %92 : vector<2x96xf32>
    %94 = math.exp %93 : vector<2x96xf32>
    %cst_21 = arith.constant 1.000000e+00 : f32
    %95 = vector.broadcast %cst_21 : f32 to vector<2x96xf32>
    %96 = arith.addf %95, %94 : vector<2x96xf32>
    %97 = arith.divf %95, %96 : vector<2x96xf32>
    %98 = vector.extract_strided_slice %91 {offsets = [0, 96], sizes = [2, 32], strides = [1, 1]} : vector<2x128xf32> to vector<2x32xf32>
    %99 = math.tanh %98 : vector<2x32xf32>
    %100 = vector.extract_strided_slice %97 {offsets = [0, 0], sizes = [2, 32], strides = [1, 1]} : vector<2x96xf32> to vector<2x32xf32>
    %101 = vector.extract_strided_slice %97 {offsets = [0, 32], sizes = [2, 32], strides = [1, 1]} : vector<2x96xf32> to vector<2x32xf32>
    %102 = vector.extract_strided_slice %97 {offsets = [0, 64], sizes = [2, 32], strides = [1, 1]} : vector<2x96xf32> to vector<2x32xf32>
    %103 = arith.mulf %101, %84 : vector<2x32xf32>
    %104 = arith.mulf %100, %99 : vector<2x32xf32>
    %105 = arith.addf %103, %104 : vector<2x32xf32>
    %106 = math.tanh %105 : vector<2x32xf32>
    %107 = arith.mulf %102, %106 : vector<2x32xf32>
    %c5_i32 = arith.constant 5 : i32
    %cst_22 = arith.constant dense<0.000000e+00> : vector<2x128xf32>
    %108 = tpu.matmul %107, %0, %cst_22 {dimension_numbers = #tpu.dot_dimension_numbers<[1], [0], [0], [1], [0, 0, 1, 1], [], []>} : vector<2x32xf32>, vector<32x128xf32>, vector<2x128xf32> -> vector<2x128xf32>
    %109 = arith.index_cast %c5_i32 : i32 to index
    %c0_23 = arith.constant 0 : index
    %c0_24 = arith.constant 0 : index
    %110 = vector.load %arg0[%109, %c0_23, %c0_24] : memref<8x2x128xf32, #tpu.memory_space<vmem>>, vector<1x2x128xf32>
    %111 = vector.shape_cast %110 : vector<1x2x128xf32> to vector<2x128xf32>
    %112 = arith.addf %108, %111 : vector<2x128xf32>
    %113 = vector.extract_strided_slice %112 {offsets = [0, 0], sizes = [2, 96], strides = [1, 1]} : vector<2x128xf32> to vector<2x96xf32>
    %114 = arith.negf %113 : vector<2x96xf32>
    %115 = math.exp %114 : vector<2x96xf32>
    %cst_25 = arith.constant 1.000000e+00 : f32
    %116 = vector.broadcast %cst_25 : f32 to vector<2x96xf32>
    %117 = arith.addf %116, %115 : vector<2x96xf32>
    %118 = arith.divf %116, %117 : vector<2x96xf32>
    %119 = vector.extract_strided_slice %112 {offsets = [0, 96], sizes = [2, 32], strides = [1, 1]} : vector<2x128xf32> to vector<2x32xf32>
    %120 = math.tanh %119 : vector<2x32xf32>
    %121 = vector.extract_strided_slice %118 {offsets = [0, 0], sizes = [2, 32], strides = [1, 1]} : vector<2x96xf32> to vector<2x32xf32>
    %122 = vector.extract_strided_slice %118 {offsets = [0, 32], sizes = [2, 32], strides = [1, 1]} : vector<2x96xf32> to vector<2x32xf32>
    %123 = vector.extract_strided_slice %118 {offsets = [0, 64], sizes = [2, 32], strides = [1, 1]} : vector<2x96xf32> to vector<2x32xf32>
    %124 = arith.mulf %122, %105 : vector<2x32xf32>
    %125 = arith.mulf %121, %120 : vector<2x32xf32>
    %126 = arith.addf %124, %125 : vector<2x32xf32>
    %127 = math.tanh %126 : vector<2x32xf32>
    %128 = arith.mulf %123, %127 : vector<2x32xf32>
    %c6_i32 = arith.constant 6 : i32
    %cst_26 = arith.constant dense<0.000000e+00> : vector<2x128xf32>
    %129 = tpu.matmul %128, %0, %cst_26 {dimension_numbers = #tpu.dot_dimension_numbers<[1], [0], [0], [1], [0, 0, 1, 1], [], []>} : vector<2x32xf32>, vector<32x128xf32>, vector<2x128xf32> -> vector<2x128xf32>
    %130 = arith.index_cast %c6_i32 : i32 to index
    %c0_27 = arith.constant 0 : index
    %c0_28 = arith.constant 0 : index
    %131 = vector.load %arg0[%130, %c0_27, %c0_28] : memref<8x2x128xf32, #tpu.memory_space<vmem>>, vector<1x2x128xf32>
    %132 = vector.shape_cast %131 : vector<1x2x128xf32> to vector<2x128xf32>
    %133 = arith.addf %129, %132 : vector<2x128xf32>
    %134 = vector.extract_strided_slice %133 {offsets = [0, 0], sizes = [2, 96], strides = [1, 1]} : vector<2x128xf32> to vector<2x96xf32>
    %135 = arith.negf %134 : vector<2x96xf32>
    %136 = math.exp %135 : vector<2x96xf32>
    %cst_29 = arith.constant 1.000000e+00 : f32
    %137 = vector.broadcast %cst_29 : f32 to vector<2x96xf32>
    %138 = arith.addf %137, %136 : vector<2x96xf32>
    %139 = arith.divf %137, %138 : vector<2x96xf32>
    %140 = vector.extract_strided_slice %133 {offsets = [0, 96], sizes = [2, 32], strides = [1, 1]} : vector<2x128xf32> to vector<2x32xf32>
    %141 = math.tanh %140 : vector<2x32xf32>
    %142 = vector.extract_strided_slice %139 {offsets = [0, 0], sizes = [2, 32], strides = [1, 1]} : vector<2x96xf32> to vector<2x32xf32>
    %143 = vector.extract_strided_slice %139 {offsets = [0, 32], sizes = [2, 32], strides = [1, 1]} : vector<2x96xf32> to vector<2x32xf32>
    %144 = vector.extract_strided_slice %139 {offsets = [0, 64], sizes = [2, 32], strides = [1, 1]} : vector<2x96xf32> to vector<2x32xf32>
    %145 = arith.mulf %143, %126 : vector<2x32xf32>
    %146 = arith.mulf %142, %141 : vector<2x32xf32>
    %147 = arith.addf %145, %146 : vector<2x32xf32>
    %148 = math.tanh %147 : vector<2x32xf32>
    %149 = arith.mulf %144, %148 : vector<2x32xf32>
    %c7_i32 = arith.constant 7 : i32
    %cst_30 = arith.constant dense<0.000000e+00> : vector<2x128xf32>
    %150 = tpu.matmul %149, %0, %cst_30 {dimension_numbers = #tpu.dot_dimension_numbers<[1], [0], [0], [1], [0, 0, 1, 1], [], []>} : vector<2x32xf32>, vector<32x128xf32>, vector<2x128xf32> -> vector<2x128xf32>
    %151 = arith.index_cast %c7_i32 : i32 to index
    %c0_31 = arith.constant 0 : index
    %c0_32 = arith.constant 0 : index
    %152 = vector.load %arg0[%151, %c0_31, %c0_32] : memref<8x2x128xf32, #tpu.memory_space<vmem>>, vector<1x2x128xf32>
    %153 = vector.shape_cast %152 : vector<1x2x128xf32> to vector<2x128xf32>
    %154 = arith.addf %150, %153 : vector<2x128xf32>
    %155 = vector.extract_strided_slice %154 {offsets = [0, 0], sizes = [2, 96], strides = [1, 1]} : vector<2x128xf32> to vector<2x96xf32>
    %156 = arith.negf %155 : vector<2x96xf32>
    %157 = math.exp %156 : vector<2x96xf32>
    %cst_33 = arith.constant 1.000000e+00 : f32
    %158 = vector.broadcast %cst_33 : f32 to vector<2x96xf32>
    %159 = arith.addf %158, %157 : vector<2x96xf32>
    %160 = arith.divf %158, %159 : vector<2x96xf32>
    %161 = vector.extract_strided_slice %154 {offsets = [0, 96], sizes = [2, 32], strides = [1, 1]} : vector<2x128xf32> to vector<2x32xf32>
    %162 = math.tanh %161 : vector<2x32xf32>
    %163 = vector.extract_strided_slice %160 {offsets = [0, 0], sizes = [2, 32], strides = [1, 1]} : vector<2x96xf32> to vector<2x32xf32>
    %164 = vector.extract_strided_slice %160 {offsets = [0, 32], sizes = [2, 32], strides = [1, 1]} : vector<2x96xf32> to vector<2x32xf32>
    %165 = vector.extract_strided_slice %160 {offsets = [0, 64], sizes = [2, 32], strides = [1, 1]} : vector<2x96xf32> to vector<2x32xf32>
    %166 = arith.mulf %164, %147 : vector<2x32xf32>
    %167 = arith.mulf %163, %162 : vector<2x32xf32>
    %168 = arith.addf %166, %167 : vector<2x32xf32>
    %169 = math.tanh %168 : vector<2x32xf32>
    %170 = arith.mulf %165, %169 : vector<2x32xf32>
    %c8_i32 = arith.constant 8 : i32
    %c0_34 = arith.constant 0 : index
    %c0_35 = arith.constant 0 : index
    %171 = vector.load %arg2[%c0_34, %c0_35] : memref<32x8xf32, #tpu.memory_space<vmem>>, vector<32x8xf32>
    %cst_36 = arith.constant dense<0.000000e+00> : vector<2x8xf32>
    %172 = tpu.matmul %170, %171, %cst_36 {dimension_numbers = #tpu.dot_dimension_numbers<[1], [0], [0], [1], [0, 0, 1, 1], [], []>} : vector<2x32xf32>, vector<32x8xf32>, vector<2x8xf32> -> vector<2x8xf32>
    %c0_37 = arith.constant 0 : index
    %c0_38 = arith.constant 0 : index
    %173 = vector.load %arg3[%c0_37, %c0_38] : memref<1x8xf32, #tpu.memory_space<vmem>>, vector<1x8xf32>
    %174 = vector.broadcast %173 : vector<1x8xf32> to vector<2x8xf32>
    %175 = arith.addf %172, %174 : vector<2x8xf32>
    %c0_39 = arith.constant 0 : index
    %c0_40 = arith.constant 0 : index
    %176 = vector.load %arg4[%c0_39, %c0_40] : memref<2x8xf32, #tpu.memory_space<vmem>>, vector<2x8xf32>
    tpu.vector_store %arg4[%c0_39, %c0_40], %175 {strides = array<i32>} : memref<2x8xf32, #tpu.memory_space<vmem>>, vector<2x8xf32>,
    return
  }
}

</mosaic_0001>

<bundles_post_ra>
// kernel: wine_embedding_forward.1
= control target key start
LH: loop header
LB: loop body
LE: loop exit
PB: predicated region body
PF: predicated region fallthrough
CT: control target
= control target key end

     0   :  { %v1189_v1 = vmov 0.0   ;;  %vm1190_vm0 = vmmov 0   ;;  %s1408_s0 = inlined_call_operand.vmem [shape: f32[8,2,128], index: 0, kind: input, shape index: {}]   ;;  %s1409_s1 = inlined_call_operand.vmem [shape: f32[32,128], index: 1, kind: input, shape index: {}]   ;;  %s1410_s2 = inlined_call_operand.vmem [shape: f32[32,8], index: 2, kind: input, shape index: {}]   ;;  %s1411_s3 = inlined_call_operand.vmem [shape: f32[1,8], index: 3, kind: input, shape index: {}]   ;;  %s1412_s4 = inlined_call_operand.hbm [shape: f32[2,8], index: 4, kind: output, shape index: {}]  }
   0x1   :  { %v1222_v0 = vld [vmem:[%s1409_s1 + $0x18] sm:$0xff]  ;;  %999 = vmatprep.subr.mxu0 %v1189_v1  ;;  %v1228_v2 = vld [vmem:[%s1409_s1 + $0x10] sm:$0xff]  ;;  %1007 = vmatprep.mubr.msk.f32.mxu0 %vm1190_vm0, %v1189_v1 }
   0x2   :  { %9 = vsyncpa [#allocation3], 0  ;;  %1000 = vmatpush3.msra.mxu0 %v1222_v0  ;;  %1010 = vmatprep.subr.mxu1 %v1189_v1  ;;  %v1238_v3 = vld [vmem:[%s1409_s1 + $0x8] sm:$0xff]  ;;  %v1247_v4 = vld [vmem:[%s1409_s1] sm:$0xff]  ;;  %s1191_s24 = smov 32   ;;  %s1192_s25 = smov 64  }
   0x3   :  { %1001 = vmatprep.subr.mxu0 %v1189_v1  ;;  %1011 = vmatpush3.msra.mxu1 %v1222_v0  ;;  %v22_v5 = vld [vmem:[%s1408_s0] sm:$0x3]  ;;  %vm23_vm1 = vcmask 261120   ;;  %v931_v23 = vld [vmem:[%s1408_s0 + $0x2] sm:$0x3]  ;;  %s1193_s1 = smov [#allocation2]  }
   0x4   :  { %1002 = vmatpush3.msra.mxu0 %v1228_v2  ;;  %1012 = vmatprep.subr.mxu1 %v1189_v1  ;;  %v934_v41 = vld [vmem:[%s1408_s0 + $0x4] sm:$0x3]  ;;  %v937_v59 = vld [vmem:[%s1408_s0 + $0x6] sm:$0x3]  ;;  %vm914_vm2 = vcmask 58368  }
   0x5   :  { %1003 = vmatprep.subr.mxu0 %v1189_v1  ;;  %1013 = vmatpush3.msra.mxu1 %v1228_v2 }
   0x6   :  { %1004 = vmatpush3.msra.mxu0 %v1238_v3  ;;  %1014 = vmatprep.subr.mxu1 %v1189_v1 }
   0x7   :  { %1005 = vmatprep.subr.mxu0 %v1189_v1  ;;  %1015 = vmatpush3.msra.mxu1 %v1238_v3 }
   0x8   :  { %1006 = vmatpush3.msra.mxu0 %v1247_v4  ;;  %1016 = vmatprep.subr.mxu1 %v1189_v1 }
   0x9   :  { %1008 = vmatmul.mubr.f32.vlgmr.msra.gmra.mxu0 %v1189_v1  ;;  %1017 = vmatpush3.msra.mxu1 %v1247_v4 }
   0xa   :  { %1018 = vmatprep.mubr.msk.f32.mxu1 %vm1190_vm0, %v1189_v1  ;;  %1021 = vmatprep.subr.mxu0 %v1189_v1 }
   0xb   :  { %1022 = vmatpush3.msra.mxu0 %v1222_v0  ;;  %1029 = vmatprep.mubr.msk.f32.mxu0 %vm1190_vm0, %v1189_v1 }
   0xc   :  { %1023 = vmatprep.subr.mxu0 %v1189_v1  ;;  %1032 = vmatprep.subr.mxu1 %v1189_v1 }
   0xd   :  { %1024 = vmatpush3.msra.mxu0 %v1228_v2 }
   0xe   :  { %1025 = vmatprep.subr.mxu0 %v1189_v1 }
   0xf   :  { %1026 = vmatpush3.msra.mxu0 %v1238_v3 }
  0x10   :  { %1027 = vmatprep.subr.mxu0 %v1189_v1 }
  0x11   :  { %1028 = vmatpush3.msra.mxu0 %v1247_v4 }
  0x12   :  { %1043 = vmatprep.subr.mxu0 %v1189_v1 }
  0xc9   :  { %v93_v6 = vpop.f32.mrf.mxu0 }
  0xca   :  { %v94_v7 = vadd.f32 %v93_v6, %v22_v5 }
  0xcb   :  { %v1009_v8 = vpop.f32.mrf.mxu0 }
  0xcc   :  { %1103 = vtanh.f32 %v94_v7  ;;  %v930_v10 = vmul.f32 -1.442695, %v94_v7 }
  0xce   :  { %1105 = vpow2.f32 %v930_v10 }
  0xd9   :  { %v1104_v9 = vpop.eup %1103 }
  0xda   :  { %106 = vrot.lane.b32.xlu0 %v1104_v9, %s1191_s24 }
  0xdb   :  { %v1106_v11 = vpop.eup %1105 }
  0xdc   :  { %v100_v12 = vadd.f32 1.0, %v1106_v11 }
  0xde   :  { %1107 = vrcp.f32 %v100_v12 }
  0xeb   :  { %v1108_v13 = vpop.eup %1107 }
  0xec   :  { %v104_v16 = vmul.f32 0.0, %v1108_v13 }
 0x14c   :  { %v107_v14 = vpop.permute.xlu0 %106 }
 0x14d   :  { %v109_v15 = vmul.f32 %v1108_v13, %v107_v14 }
 0x14f   :  { %111 = vrot.lane.b32.xlu0 %v109_v15, %s1191_s24 }
 0x1c1   :  { %v112_v17 = vpop.permute.xlu0 %111 }
 0x1c2   :  { %v114_v18 = vadd.f32 %v112_v17, %v104_v16 }
 0x1c4   :  { %1109 = vtanh.f32 %v114_v18 }
 0x1d1   :  { %v1110_v19 = vpop.eup %1109 }
 0x1d2   :  { %117 = vrot.lane.b32.xlu1 %v1110_v19, %s1191_s24 }
 0x244   :  { %v118_v20 = vpop.permute.xlu1 %117 }
 0x245   :  { %v120_v21 = vmul.f32 %v1108_v13, %v118_v20 }
 0x247   :  { %124 = vrot.lane.b32.xlu1 %v120_v21, %s1192_s25 }
 0x2b9   :  { %v125_v22 = vpop.permute.xlu1 %124 }
 0x2ba   :  { %1019 = vmatmul.mubr.msk.f32.vlgmr.msra.gmra.mxu1 %vm23_vm1, %v125_v22 }
 0x2bb   :  { %1033 = vmatpush3.msra.mxu1 %v1222_v0  ;;  %1040 = vmatprep.mubr.msk.f32.mxu1 %vm1190_vm0, %v1189_v1 }
 0x2bc   :  { %1034 = vmatprep.subr.mxu1 %v1189_v1 }
 0x2bd   :  { %1035 = vmatpush3.msra.mxu1 %v1228_v2 }
 0x2be   :  { %1036 = vmatprep.subr.mxu1 %v1189_v1 }
 0x2bf   :  { %1037 = vmatpush3.msra.mxu1 %v1238_v3 }
 0x2c0   :  { %1038 = vmatprep.subr.mxu1 %v1189_v1 }
 0x2c1   :  { %1039 = vmatpush3.msra.mxu1 %v1247_v4 }
 0x2c2   :  { %1054 = vmatprep.subr.mxu1 %v1189_v1 }
 0x37a   :  { %v194_v24 = vpop.f32.mrf.mxu1 }
 0x37b   :  { %v195_v25 = vadd.f32 %v931_v23, %v194_v24 }
 0x37c   :  { %v1020_v26 = vpop.f32.mrf.mxu1 }
 0x37d   :  { %1111 = vtanh.f32 %v195_v25  ;;  %v933_v28 = vmul.f32 -1.442695, %v195_v25 }
 0x37f   :  { %1113 = vpow2.f32 %v933_v28 }
 0x38a   :  { %v1112_v27 = vpop.eup %1111 }
 0x38b   :  { %207 = vrot.lane.b32.xlu0 %v1112_v27, %s1191_s24 }
 0x38c   :  { %v1114_v29 = vpop.eup %1113 }
 0x38d   :  { %v201_v30 = vadd.f32 1.0, %v1114_v29 }
 0x38f   :  { %1115 = vrcp.f32 %v201_v30 }
 0x39c   :  { %v1116_v31 = vpop.eup %1115 }
 0x39d   :  { %v205_v34 = vmul.f32 %v1116_v31, %v114_v18  ;;  %v940_v18 = vld [vmem:[%s1408_s0 + $0x8] sm:$0x3] }
 0x3fd   :  { %v208_v32 = vpop.permute.xlu0 %207 }
 0x3fe   :  { %v210_v33 = vmul.f32 %v1116_v31, %v208_v32 }
 0x400   :  { %212 = vrot.lane.b32.xlu1 %v210_v33, %s1191_s24 }
 0x472   :  { %v213_v35 = vpop.permute.xlu1 %212 }
 0x473   :  { %v215_v36 = vadd.f32 %v213_v35, %v205_v34 }
 0x475   :  { %1117 = vtanh.f32 %v215_v36 }
 0x482   :  { %v1118_v37 = vpop.eup %1117 }
 0x483   :  { %218 = vrot.lane.b32.xlu0 %v1118_v37, %s1191_s24 }
 0x4f5   :  { %v219_v38 = vpop.permute.xlu0 %218 }
 0x4f6   :  { %v221_v39 = vmul.f32 %v1116_v31, %v219_v38 }
 0x4f8   :  { %225 = vrot.lane.b32.xlu1 %v221_v39, %s1192_s25 }
 0x56a   :  { %v226_v40 = vpop.permute.xlu1 %225 }
 0x56b   :  { %1030 = vmatmul.mubr.msk.f32.vlgmr.msra.gmra.mxu0 %vm23_vm1, %v226_v40 }
 0x56c   :  { %1044 = vmatpush3.msra.mxu0 %v1222_v0  ;;  %1051 = vmatprep.mubr.msk.f32.mxu0 %vm1190_vm0, %v1189_v1 }
 0x56d   :  { %1045 = vmatprep.subr.mxu0 %v1189_v1 }
 0x56e   :  { %1046 = vmatpush3.msra.mxu0 %v1228_v2 }
 0x56f   :  { %1047 = vmatprep.subr.mxu0 %v1189_v1 }
 0x570   :  { %1048 = vmatpush3.msra.mxu0 %v1238_v3 }
 0x571   :  { %1049 = vmatprep.subr.mxu0 %v1189_v1 }
 0x572   :  { %1050 = vmatpush3.msra.mxu0 %v1247_v4 }
 0x573   :  { %1065 = vmatprep.subr.mxu0 %v1189_v1 }
 0x62b   :  { %v295_v42 = vpop.f32.mrf.mxu0 }
 0x62c   :  { %v296_v43 = vadd.f32 %v934_v41, %v295_v42 }
 0x62d   :  { %v1031_v44 = vpop.f32.mrf.mxu0 }
 0x62e   :  { %1119 = vtanh.f32 %v296_v43  ;;  %v936_v46 = vmul.f32 -1.442695, %v296_v43 }
 0x630   :  { %1121 = vpow2.f32 %v936_v46 }
 0x63b   :  { %v1120_v45 = vpop.eup %1119 }
 0x63c   :  { %308 = vrot.lane.b32.xlu0 %v1120_v45, %s1191_s24 }
 0x63d   :  { %v1122_v47 = vpop.eup %1121 }
 0x63e   :  { %v302_v48 = vadd.f32 1.0, %v1122_v47 }
 0x640   :  { %1123 = vrcp.f32 %v302_v48 }
 0x64d   :  { %v1124_v49 = vpop.eup %1123 }
 0x64e   :  { %v306_v52 = vmul.f32 %v1124_v49, %v215_v36  ;;  %v943_v36 = vld [vmem:[%s1408_s0 + $0xa] sm:$0x3] }
 0x6ae   :  { %v309_v50 = vpop.permute.xlu0 %308 }
 0x6af   :  { %v311_v51 = vmul.f32 %v1124_v49, %v309_v50  ;;  %v946_v50 = vld [vmem:[%s1408_s0 + $0xc] sm:$0x3] }
 0x6b1   :  { %313 = vrot.lane.b32.xlu1 %v311_v51, %s1191_s24 }
 0x723   :  { %v314_v53 = vpop.permute.xlu1 %313 }
 0x724   :  { %v316_v54 = vadd.f32 %v314_v53, %v306_v52 }
 0x726   :  { %1125 = vtanh.f32 %v316_v54 }
 0x733   :  { %v1126_v55 = vpop.eup %1125 }
 0x734   :  { %319 = vrot.lane.b32.xlu0 %v1126_v55, %s1191_s24 }
 0x7a6   :  { %v320_v56 = vpop.permute.xlu0 %319 }
 0x7a7   :  { %v322_v57 = vmul.f32 %v1124_v49, %v320_v56 }
 0x7a9   :  { %326 = vrot.lane.b32.xlu1 %v322_v57, %s1192_s25 }
 0x81b   :  { %v327_v58 = vpop.permute.xlu1 %326 }
 0x81c   :  { %1041 = vmatmul.mubr.msk.f32.vlgmr.msra.gmra.mxu1 %vm23_vm1, %v327_v58 }
 0x81d   :  { %1055 = vmatpush3.msra.mxu1 %v1222_v0  ;;  %1062 = vmatprep.mubr.msk.f32.mxu1 %vm1190_vm0, %v1189_v1 }
 0x81e   :  { %1056 = vmatprep.subr.mxu1 %v1189_v1 }
 0x81f   :  { %1057 = vmatpush3.msra.mxu1 %v1228_v2 }
 0x820   :  { %1058 = vmatprep.subr.mxu1 %v1189_v1 }
 0x821   :  { %1059 = vmatpush3.msra.mxu1 %v1238_v3 }
 0x822   :  { %1060 = vmatprep.subr.mxu1 %v1189_v1 }
 0x823   :  { %1061 = vmatpush3.msra.mxu1 %v1247_v4 }
 0x824   :  { %1076 = vmatprep.subr.mxu1 %v1189_v1 }
 0x8dc   :  { %v396_v60 = vpop.f32.mrf.mxu1 }
 0x8dd   :  { %v397_v61 = vadd.f32 %v937_v59, %v396_v60 }
 0x8de   :  { %v1042_v62 = vpop.f32.mrf.mxu1 }
 0x8df   :  { %1127 = vtanh.f32 %v397_v61  ;;  %v939_v5 = vmul.f32 -1.442695, %v397_v61 }
 0x8e1   :  { %1129 = vpow2.f32 %v939_v5 }
 0x8ec   :  { %v1128_v63 = vpop.eup %1127 }
 0x8ed   :  { %409 = vrot.lane.b32.xlu0 %v1128_v63, %s1191_s24 }
 0x8ee   :  { %v1130_v6 = vpop.eup %1129 }
 0x8ef   :  { %v403_v7 = vadd.f32 1.0, %v1130_v6 }
 0x8f1   :  { %1131 = vrcp.f32 %v403_v7 }
 0x8fe   :  { %v1132_v8 = vpop.eup %1131 }
 0x8ff   :  { %v407_v11 = vmul.f32 %v1132_v8, %v316_v54 }
 0x95f   :  { %v410_v9 = vpop.permute.xlu0 %409 }
 0x960   :  { %v412_v10 = vmul.f32 %v1132_v8, %v410_v9  ;;  %v949_v9 = vld [vmem:[%s1408_s0 + $0xe] sm:$0x3] }
 0x962   :  { %414 = vrot.lane.b32.xlu1 %v412_v10, %s1191_s24 }
 0x9d4   :  { %v415_v12 = vpop.permute.xlu1 %414 }
 0x9d5   :  { %v417_v13 = vadd.f32 %v415_v12, %v407_v11 }
 0x9d7   :  { %1133 = vtanh.f32 %v417_v13 }
 0x9e4   :  { %v1134_v14 = vpop.eup %1133 }
 0x9e5   :  { %420 = vrot.lane.b32.xlu0 %v1134_v14, %s1191_s24 }
 0xa57   :  { %v421_v15 = vpop.permute.xlu0 %420 }
 0xa58   :  { %v423_v16 = vmul.f32 %v1132_v8, %v421_v15 }
 0xa5a   :  { %427 = vrot.lane.b32.xlu1 %v423_v16, %s1192_s25 }
 0xacc   :  { %v428_v17 = vpop.permute.xlu1 %427 }
 0xacd   :  { %1052 = vmatmul.mubr.msk.f32.vlgmr.msra.gmra.mxu0 %vm23_vm1, %v428_v17 }
 0xace   :  { %1066 = vmatpush3.msra.mxu0 %v1222_v0  ;;  %1073 = vmatprep.mubr.msk.f32.mxu0 %vm1190_vm0, %v1189_v1 }
 0xacf   :  { %1067 = vmatprep.subr.mxu0 %v1189_v1 }
 0xad0   :  { %1068 = vmatpush3.msra.mxu0 %v1228_v2 }
 0xad1   :  { %1069 = vmatprep.subr.mxu0 %v1189_v1 }
 0xad2   :  { %1070 = vmatpush3.msra.mxu0 %v1238_v3 }
 0xad3   :  { %1071 = vmatprep.subr.mxu0 %v1189_v1 }
 0xad4   :  { %1072 = vmatpush3.msra.mxu0 %v1247_v4 }
 0xad5   :  { %1087 = vmatprep.subr.mxu0 %v1189_v1 }
 0xb8d   :  { %v497_v19 = vpop.f32.mrf.mxu0 }
 0xb8e   :  { %v498_v20 = vadd.f32 %v940_v18, %v497_v19 }
 0xb8f   :  { %v1053_v21 = vpop.f32.mrf.mxu0 }
 0xb90   :  { %1135 = vtanh.f32 %v498_v20  ;;  %v942_v23 = vmul.f32 -1.442695, %v498_v20 }
 0xb92   :  { %1137 = vpow2.f32 %v942_v23  ;;  %v831_v23 = vld [vmem:[%s1410_s2 + $0x18] sm:$0xff] }
 0xb9d   :  { %v1136_v22 = vpop.eup %1135 }
 0xb9e   :  { %510 = vrot.lane.b32.xlu0 %v1136_v22, %s1191_s24 }
 0xb9f   :  { %v1138_v24 = vpop.eup %1137 }
 0xba0   :  { %v504_v25 = vadd.f32 1.0, %v1138_v24  ;;  %v830_v24 = vld [vmem:[%s1410_s2 + $0x10] sm:$0xff] }
 0xba2   :  { %1139 = vrcp.f32 %v504_v25  ;;  %v829_v25 = vld [vmem:[%s1410_s2 + $0x8] sm:$0xff] }
 0xbaf   :  { %v1140_v26 = vpop.eup %1139 }
 0xbb0   :  { %v508_v29 = vmul.f32 %v1140_v26, %v417_v13 }
 0xc10   :  { %v511_v27 = vpop.permute.xlu0 %510 }
 0xc11   :  { %v513_v28 = vmul.f32 %v1140_v26, %v511_v27 }
 0xc13   :  { %515 = vrot.lane.b32.xlu1 %v513_v28, %s1191_s24 }
 0xc85   :  { %v516_v30 = vpop.permute.xlu1 %515 }
 0xc86   :  { %v518_v31 = vadd.f32 %v516_v30, %v508_v29 }
 0xc88   :  { %1141 = vtanh.f32 %v518_v31 }
 0xc95   :  { %v1142_v32 = vpop.eup %1141 }
 0xc96   :  { %521 = vrot.lane.b32.xlu0 %v1142_v32, %s1191_s24 }
 0xd08   :  { %v522_v33 = vpop.permute.xlu0 %521 }
 0xd09   :  { %v524_v34 = vmul.f32 %v1140_v26, %v522_v33  ;;  %v828_v26 = vld [vmem:[%s1410_s2] sm:$0xff]  ;;  %s922_s2 = sshll.u32 %s1193_s1, 4  ;;  %s923_s2 = int_to_ptr.vmem [resolvable:$true] %s922_s2 }
 0xd0a   :  { %s1167_s23 = scalar_lea.vmem %s923_s2, 32  ;;  %p1172_p1 = scmp.lt.s32.totalorder %s923_s2, %s923_s2 }
 0xd0b   :  { %528 = vrot.lane.b32.xlu1 %v524_v34, %s1192_s25  ;;  %p1168_p0 = scmp.ne.s32.totalorder %s923_s2, %s1167_s23  ;;  %p1173_p2 = scmp.lt.s32.totalorder %s1167_s23, %s1167_s23 }
 0xd0d   :  { %p1174_p3 = por %p1173_p2, %p1172_p1 }
 0xd0f   :  { %p1175_p4 = pnand %p1174_p3, %p1168_p0 }
 0xd7d   :  { %v529_v35 = vpop.permute.xlu1 %528 }
 0xd7e   :  { %1063 = vmatmul.mubr.msk.f32.vlgmr.msra.gmra.mxu1 %vm23_vm1, %v529_v35 }
 0xd7f   :  { %1077 = vmatpush3.msra.mxu1 %v1222_v0  ;;  %1084 = vmatprep.mubr.msk.f32.mxu1 %vm1190_vm0, %v1189_v1 }
 0xd80   :  { %1078 = vmatprep.subr.mxu1 %v1189_v1 }
 0xd81   :  { %1079 = vmatpush3.msra.mxu1 %v1228_v2 }
 0xd82   :  { %1080 = vmatprep.subr.mxu1 %v1189_v1 }
 0xd83   :  { %1081 = vmatpush3.msra.mxu1 %v1238_v3 }
 0xd84   :  { %1082 = vmatprep.subr.mxu1 %v1189_v1 }
 0xd85   :  { %1083 = vmatpush3.msra.mxu1 %v1247_v4 }
 0xe3e   :  { %v598_v0 = vpop.f32.mrf.mxu1 }
 0xe3f   :  { %v599_v37 = vadd.f32 %v943_v36, %v598_v0 }
 0xe40   :  { %v1064_v38 = vpop.f32.mrf.mxu1 }
 0xe41   :  { %1143 = vtanh.f32 %v599_v37  ;;  %v945_v2 = vmul.f32 -1.442695, %v599_v37 }
 0xe43   :  { %1145 = vpow2.f32 %v945_v2 }
 0xe4e   :  { %v1144_v39 = vpop.eup %1143 }
 0xe4f   :  { %611 = vrot.lane.b32.xlu0 %v1144_v39, %s1191_s24 }
 0xe50   :  { %v1146_v40 = vpop.eup %1145 }
 0xe51   :  { %v605_v41 = vadd.f32 1.0, %v1146_v40 }
 0xe53   :  { %1147 = vrcp.f32 %v605_v41 }
 0xe60   :  { %v1148_v3 = vpop.eup %1147 }
 0xe61   :  { %v609_v4 = vmul.f32 %v1148_v3, %v518_v31  ;;  %v952_v31 = vld [vmem:[%s1411_s3] ss:$0 sm:$0xff] }
 0xec1   :  { %v612_v42 = vpop.permute.xlu0 %611 }
 0xec2   :  { %v614_v43 = vmul.f32 %v1148_v3, %v612_v42 }
 0xec4   :  { %616 = vrot.lane.b32.xlu1 %v614_v43, %s1191_s24 }
 0xf36   :  { %v617_v44 = vpop.permute.xlu1 %616 }
 0xf37   :  { %v619_v45 = vadd.f32 %v617_v44, %v609_v4 }
 0xf39   :  { %1149 = vtanh.f32 %v619_v45 }
 0xf46   :  { %v1150_v46 = vpop.eup %1149 }
 0xf47   :  { %622 = vrot.lane.b32.xlu0 %v1150_v46, %s1191_s24 }
 0xfb9   :  { %v623_v47 = vpop.permute.xlu0 %622 }
 0xfba   :  { %v625_v48 = vmul.f32 %v1148_v3, %v623_v47 }
 0xfbc   :  { %629 = vrot.lane.b32.xlu1 %v625_v48, %s1192_s25 }
0x102e   :  { %v630_v49 = vpop.permute.xlu1 %629 }
0x102f   :  { %1074 = vmatmul.mubr.msk.f32.vlgmr.msra.gmra.mxu0 %vm23_vm1, %v630_v49 }
0x1030   :  { %1095 = vmatprep.mubr.msk.f32.mxu0 %vm1190_vm0, %v1189_v1  ;;  %1088 = vmatpush3.msra.mxu0 %v831_v23 }
0x1031   :  { %1089 = vmatprep.subr.mxu0 %v1189_v1 }
0x1032   :  { %1090 = vmatpush3.msra.mxu0 %v830_v24 }
0x1033   :  { %1091 = vmatprep.subr.mxu0 %v1189_v1 }
0x1034   :  { %1092 = vmatpush3.msra.mxu0 %v829_v25 }
0x1035   :  { %1093 = vmatprep.subr.mxu0 %v1189_v1 }
0x1036   :  { %1094 = vmatpush3.msra.mxu0 %v828_v26 }
0x10ef   :  { %v699_v51 = vpop.f32.mrf.mxu0 }
0x10f0   :  { %v700_v52 = vadd.f32 %v946_v50, %v699_v51 }
0x10f1   :  { %v1075_v53 = vpop.f32.mrf.mxu0 }
0x10f2   :  { %1151 = vtanh.f32 %v700_v52  ;;  %v948_v55 = vmul.f32 -1.442695, %v700_v52 }
0x10f4   :  { %1153 = vpow2.f32 %v948_v55 }
0x10ff   :  { %v1152_v54 = vpop.eup %1151 }
0x1100   :  { %712 = vrot.lane.b32.xlu0 %v1152_v54, %s1191_s24 }
0x1101   :  { %v1154_v56 = vpop.eup %1153 }
0x1102   :  { %v706_v57 = vadd.f32 1.0, %v1154_v56 }
0x1104   :  { %1155 = vrcp.f32 %v706_v57 }
0x1111   :  { %v1156_v58 = vpop.eup %1155 }
0x1112   :  { %v710_v61 = vmul.f32 %v1156_v58, %v619_v45 }
0x1172   :  { %v713_v59 = vpop.permute.xlu0 %712 }
0x1173   :  { %v715_v60 = vmul.f32 %v1156_v58, %v713_v59 }
0x1175   :  { %717 = vrot.lane.b32.xlu1 %v715_v60, %s1191_s24 }
0x11e7   :  { %v718_v62 = vpop.permute.xlu1 %717 }
0x11e8   :  { %v720_v63 = vadd.f32 %v718_v62, %v710_v61 }
0x11ea   :  { %1157 = vtanh.f32 %v720_v63 }
0x11f7   :  { %v1158_v5 = vpop.eup %1157 }
0x11f8   :  { %723 = vrot.lane.b32.xlu0 %v1158_v5, %s1191_s24 }
0x126a   :  { %v724_v6 = vpop.permute.xlu0 %723 }
0x126b   :  { %v726_v7 = vmul.f32 %v1156_v58, %v724_v6 }
0x126d   :  { %730 = vrot.lane.b32.xlu1 %v726_v7, %s1192_s25 }
0x12df   :  { %v731_v8 = vpop.permute.xlu1 %730 }
0x12e0   :  { %1085 = vmatmul.mubr.msk.f32.vlgmr.msra.gmra.mxu1 %vm23_vm1, %v731_v8 }
0x13a0   :  { %v800_v10 = vpop.f32.mrf.mxu1 }
0x13a1   :  { %v801_v11 = vadd.f32 %v949_v9, %v800_v10 }
0x13a2   :  { %v1086_v12 = vpop.f32.mrf.mxu1 }
0x13a3   :  { %1159 = vtanh.f32 %v801_v11  ;;  %v951_v14 = vmul.f32 -1.442695, %v801_v11 }
0x13a5   :  { %1161 = vpow2.f32 %v951_v14 }
0x13b0   :  { %v1160_v13 = vpop.eup %1159 }
0x13b1   :  { %813 = vrot.lane.b32.xlu0 %v1160_v13, %s1191_s24 }
0x13b2   :  { %v1162_v15 = vpop.eup %1161 }
0x13b3   :  { %v807_v16 = vadd.f32 1.0, %v1162_v15 }
0x13b5   :  { %1163 = vrcp.f32 %v807_v16 }
0x13c2   :  { %v1164_v17 = vpop.eup %1163 }
0x13c3   :  { %v811_v20 = vmul.f32 %v1164_v17, %v720_v63 }
0x1423   :  { %v814_v18 = vpop.permute.xlu0 %813 }
0x1424   :  { %v816_v19 = vmul.f32 %v1164_v17, %v814_v18 }
0x1426   :  { %818 = vrot.lane.b32.xlu1 %v816_v19, %s1191_s24 }
0x1498   :  { %v819_v21 = vpop.permute.xlu1 %818 }
0x1499   :  { %v821_v22 = vadd.f32 %v819_v21, %v811_v20 }
0x149b   :  { %1165 = vtanh.f32 %v821_v22 }
0x14a8   :  { %v1166_v27 = vpop.eup %1165 }
0x14a9   :  { %824 = vrot.lane.b32.xlu0 %v1166_v27, %s1191_s24 }
0x151b   :  { %v825_v28 = vpop.permute.xlu0 %824 }
0x151c   :  { %v827_v29 = vmul.f32 %v1164_v17, %v825_v28 }
0x151e   :  { %840 = vrot.lane.b32.xlu1 %v827_v29, %s1192_s25 }
0x1590   :  { %v841_v30 = vpop.permute.xlu1 %840 }
0x1591   :  { %1096 = vmatmul.mubr.msk.f32.vlgmr.msra.gmra.mxu0 %vm23_vm1, %v841_v30 }
0x1651   :  { %v910_v32 = vpop.f32.mrf.mxu0 }
0x1652   :  { %v911_v1 = vadd.f32 %v952_v31, %v910_v32 }
0x1653   :  { %v1097_v33 = vpop.f32.mrf.mxu0 }
0x1654   :  { %915 = vst.msk [vmem:[#allocation2] sm:$0x3] %vm914_vm2, %v911_v1 }
0x1655   :  { %1178 = shalt.err (!%p1175_p4)
}
0x1656   :  { %925 = dma.vmem_to_hbm [thread:$0]  %s923_s2, 32, %s1412_s4, [#allocation3]  }
0x1657   :  { %1187 = dma.done.wait [#allocation3], 32  }
0x1658   :  { %1188 = vsyncadd [#allocation3], 4294967264 }
0x1659   :  { %929 = vsyncpa [#allocation3], 1 }

</bundles_post_ra>
